<compile_context>
chip_gen: v5e
topology: v5e:2x2
jax: 0.10.0
libtpu: 0.0.40
codegen_flags: <defaults>
</compile_context>

<pallas_src>
import functools

import jax
import jax.numpy as jnp
from jax.experimental import pallas as pl
from jax.experimental.pallas import tpu as pltpu

COEFFICIENT = 2.5   # fixed in t_score_loss body
EPS = 1e-4          # fixed in t_score_loss body

_LANES = 128
_MAX_TILE_ROWS = 8192
# Double-buffered input budget (2 inputs x 2 buffers); 8 MiB keeps headroom
# under v5e's 16 MiB default scoped VMEM and is tiny on v6e/v7x.
_VMEM_INPUT_BUDGET = 8 * 1024 * 1024


def _cdiv(a: int, b: int) -> int:
    return -(-a // b)


def _round_up(n: int, m: int) -> int:
    return _cdiv(n, m) * m


def _sublane_multiple(dtype) -> int:
    # f32 -> 8, bf16/f16 -> 16, 1-byte -> 32
    return max(8, 32 // jnp.dtype(dtype).itemsize)


def _pow_2p5(x):
    # x >= 0 on valid data (x = 1 - y, y in [0, 1]); x**2.5 = x*x*sqrt(x)
    # (one EUP sqrt instead of pow's exp/log chain).
    return x * x * jnp.sqrt(x)


def _tscore_kernel(x_ref, t_ref, out_ref, *, rows_total, tile_rows):
    """One grid step = one (tile_rows, 128) tile of the flattened inputs.

    Writes lane-dense per-tile partials:
      out_ref[0, 0, :] = per-lane sum of (1 - y1)**2.5 over this tile
      out_ref[0, 1, :] = per-lane sum of (1 - y2)**2.5 over this tile
    """
    x = x_ref[...].astype(jnp.float32)
    t = t_ref[...].astype(jnp.float32)

    # sigmoid(x) == 0.5 * (tanh(x/2) + 1): one EUP op instead of exp + recip.
    o = 0.5 * (jnp.tanh(0.5 * x) + 1.0)
    one_m_y1 = 1.0 - o * t                     # 1 - y1
    one_m_y2 = 1.0 - (1.0 - o) * (1.0 - t)     # 1 - y2
    p1 = _pow_2p5(one_m_y1)                    # (1 - y1) ** 2.5
    p2 = _pow_2p5(one_m_y2)                    # (1 - y2) ** 2.5

    if rows_total % tile_rows == 0:
        # No ragged edge anywhere: zero masking cost.
        out_ref[:, 0, :] = jnp.sum(p1, axis=0, keepdims=True)
        out_ref[:, 1, :] = jnp.sum(p2, axis=0, keepdims=True)
    else:
        i = pl.program_id(0)
        last = pl.num_programs(0) - 1

        @pl.when(i != last)
        def _full_tile():
            out_ref[:, 0, :] = jnp.sum(p1, axis=0, keepdims=True)
            out_ref[:, 1, :] = jnp.sum(p2, axis=0, keepdims=True)

        @pl.when(i == last)
        def _ragged_tile():
            # Rows past the end of the array hold unspecified data (possibly
            # NaN through sqrt); jnp.where is a select, so they never reach
            # the sums.  Keep it a select — do NOT turn this into a multiply.
            row = jax.lax.broadcasted_iota(jnp.int32, p1.shape, 0)
            valid = row < (rows_total - i * tile_rows)
            out_ref[:, 0, :] = jnp.sum(jnp.where(valid, p1, 0.0),
                                       axis=0, keepdims=True)
            out_ref[:, 1, :] = jnp.sum(jnp.where(valid, p2, 0.0),
                                       axis=0, keepdims=True)


def t_score_loss_pallas(logits: jax.Array, targets: jax.Array) -> jax.Array:
    """logits: [B, N, H, W] float (f32/bf16/f16 stream as-is);
    targets: [B, N, H, W] binary masks (float / bool / (u)int8 stream as-is).
    Returns the scalar t-score loss."""
    if logits.ndim != 4:
        raise ValueError(f"Invalid input shape, we expect BxNxHxW. Got: {logits.shape}")
    if logits.shape != targets.shape:
        raise ValueError(
            f"input and target shapes must be the same. Got: {logits.shape} and {targets.shape}"
        )

    total = logits.size
    x = logits.reshape(-1)   # contiguous reshape: free, no HBM copy
    t = targets.reshape(-1)

    # Stream narrow dtypes; cast to f32 only inside the kernel (no wrapper-side
    # full-size f32 astype copies).
    if not jnp.issubdtype(x.dtype, jnp.floating):
        x = x.astype(jnp.float32)
    if t.dtype == jnp.dtype(jnp.bool_):
        t = t.astype(jnp.uint8)                 # 1 B/elem stream
    elif not (jnp.issubdtype(t.dtype, jnp.floating)
              or t.dtype in (jnp.dtype(jnp.int8), jnp.dtype(jnp.uint8))):
        t = t.astype(jnp.float32)               # rare wide-int fallback

    # Pad (only when total % 128 != 0) to whole 128-lane rows with exactly
    # neutral values: logits=-100 -> o == 0 exactly -> p2 == 0; targets=0 ->
    # p1 == 1.  See TODO(synk) in the header about making this zero-copy.
    rows = _cdiv(total, _LANES)
    padded = rows * _LANES
    if padded != total:
        pad = padded - total
        x = jnp.pad(x, (0, pad), constant_values=-100.0)
        t = jnp.pad(t, (0, pad), constant_values=0)

    x2d = x.reshape(rows, _LANES)   # free reshape (contiguous)
    t2d = t.reshape(rows, _LANES)

    align = max(_sublane_multiple(x2d.dtype), _sublane_multiple(t2d.dtype))
    bytes_per_row = _LANES * (x2d.dtype.itemsize + t2d.dtype.itemsize)
    cap = (_VMEM_INPUT_BUDGET // (2 * bytes_per_row)) // align * align
    cap = max(align, min(cap, _MAX_TILE_ROWS))
    # Aim for >= 2 tiles so the "parallel" grid axis can shard across both
    # TensorCores on v7x; the cap amortizes the ~0.35us/step grid overhead.
    tile_rows = max(align, min(cap, _round_up(_cdiv(rows, 2), align)))
    n_tiles = _cdiv(rows, tile_rows)

    kernel = functools.partial(_tscore_kernel, rows_total=rows, tile_rows=tile_rows)

    partials = pl.pallas_call(
        kernel,
        out_shape=jax.ShapeDtypeStruct((n_tiles, 2, _LANES), jnp.float32),
        grid_spec=pltpu.PrefetchScalarGridSpec(
            num_scalar_prefetch=0,
            grid=(n_tiles,),
            in_specs=[
                pl.BlockSpec((tile_rows, _LANES), lambda i: (i, 0)),
                pl.BlockSpec((tile_rows, _LANES), lambda i: (i, 0)),
            ],
            out_specs=pl.BlockSpec((1, 2, _LANES), lambda i: (i, 0, 0)),
        ),
        compiler_params=pltpu.CompilerParams(
            # Every grid step is independent -> shard across TCs on v7x.
            dimension_semantics=("parallel",),
        ),
    )(x2d, t2d)

    # Tiny finalize in the wrapper (a few hundred scalars at most).
    sum_p1 = jnp.sum(partials[:, 0, :])
    sum_p2 = jnp.sum(partials[:, 1, :])
    # sum(f1) = sum(1 - p1); wrapper-pad elements have p1 == 1 exactly, so
    # using the padded element count keeps them neutral.
    sum_f1 = jnp.float32(padded) - sum_p1
    score = sum_f1 / (sum_p2 + EPS)
    return 1.0 - score


def _reference(logits, targets):
    o = jax.nn.sigmoid(logits.astype(jnp.float32)).reshape(-1)
    t = targets.astype(jnp.float32).reshape(-1)
    y1 = o * t
    y2 = (1.0 - o) * (1.0 - t)
    f1 = 1.0 - (1.0 - y1) ** COEFFICIENT
    f2 = (1.0 - y2) ** COEFFICIENT
    return 1.0 - jnp.sum(f1) / (jnp.sum(f2) + EPS)


if __name__ == "__main__":
    key = jax.random.PRNGKey(0)
    k1, k2 = jax.random.split(key)
    B, N, H, W = 2, 4, 16, 16
    logits = jax.random.normal(k1, (B, N, H, W), dtype=jnp.float32) * 2.0
    targets = (jax.random.uniform(k2, (B, N, H, W)) > 0.5).astype(jnp.float32)

    loss = jax.block_until_ready(t_score_loss_pallas(logits, targets))
    ref = jax.block_until_ready(_reference(logits, targets))

    assert jnp.allclose(loss, ref, rtol=1e-5, atol=1e-5), (loss, ref)
    print("KERNEL_OK")
</pallas_src>

<mosaic_0001>
module attributes {stable_mosaic.version = 11 : i64} {
  func.func @_tscore_kernel(%arg0: i32, %arg1: memref<8x128xf32, #tpu.memory_space<vmem>>, %arg2: memref<8x128xf32, #tpu.memory_space<vmem>>, %arg3: memref<1x2x128xf32, #tpu.memory_space<vmem>>) attributes {dimension_semantics = [#tpu.dimension_semantics<parallel>], iteration_bounds = array<i64: 2>, scalar_prefetch = 0 : i64, scratch_operands = 0 : i64, tpu.core_type = #tpu.core_type<tc>, window_params = [{transform_indices = @transform_0, window_bounds = array<i64: 8, 128>}, {transform_indices = @transform_1, window_bounds = array<i64: 8, 128>}, {transform_indices = @transform_2, window_bounds = array<i64: 1, 2, 128>}]} {
    %c0 = arith.constant 0 : index
    %c0_0 = arith.constant 0 : index
    %0 = vector.load %arg1[%c0, %c0_0] : memref<8x128xf32, #tpu.memory_space<vmem>>, vector<8x128xf32>
    %c0_1 = arith.constant 0 : index
    %c0_2 = arith.constant 0 : index
    %1 = vector.load %arg2[%c0_1, %c0_2] : memref<8x128xf32, #tpu.memory_space<vmem>>, vector<8x128xf32>
    %cst = arith.constant 5.000000e-01 : f32
    %2 = vector.broadcast %cst : f32 to vector<8x128xf32>
    %3 = arith.mulf %2, %0 : vector<8x128xf32>
    %4 = math.tanh %3 : vector<8x128xf32>
    %cst_3 = arith.constant 1.000000e+00 : f32
    %5 = vector.broadcast %cst_3 : f32 to vector<8x128xf32>
    %6 = arith.addf %4, %5 : vector<8x128xf32>
    %cst_4 = arith.constant 5.000000e-01 : f32
    %7 = vector.broadcast %cst_4 : f32 to vector<8x128xf32>
    %8 = arith.mulf %7, %6 : vector<8x128xf32>
    %9 = arith.mulf %8, %1 : vector<8x128xf32>
    %cst_5 = arith.constant 1.000000e+00 : f32
    %10 = vector.broadcast %cst_5 : f32 to vector<8x128xf32>
    %11 = arith.subf %10, %9 : vector<8x128xf32>
    %cst_6 = arith.constant 1.000000e+00 : f32
    %12 = vector.broadcast %cst_6 : f32 to vector<8x128xf32>
    %13 = arith.subf %12, %8 : vector<8x128xf32>
    %cst_7 = arith.constant 1.000000e+00 : f32
    %14 = vector.broadcast %cst_7 : f32 to vector<8x128xf32>
    %15 = arith.subf %14, %1 : vector<8x128xf32>
    %16 = arith.mulf %13, %15 : vector<8x128xf32>
    %cst_8 = arith.constant 1.000000e+00 : f32
    %17 = vector.broadcast %cst_8 : f32 to vector<8x128xf32>
    %18 = arith.subf %17, %16 : vector<8x128xf32>
    %19 = arith.mulf %11, %11 : vector<8x128xf32>
    %20 = math.sqrt %11 : vector<8x128xf32>
    %21 = arith.mulf %19, %20 : vector<8x128xf32>
    %22 = arith.mulf %18, %18 : vector<8x128xf32>
    %23 = math.sqrt %18 : vector<8x128xf32>
    %24 = arith.mulf %22, %23 : vector<8x128xf32>
    %cst_9 = arith.constant dense<0.000000e+00> : vector<128xf32>
    %25 = vector.multi_reduction <add>, %21, %cst_9 [0] : vector<8x128xf32> to vector<128xf32>
    %26 = vector.shape_cast %25 : vector<128xf32> to vector<1x128xf32>
    %c0_10 = arith.constant 0 : index
    %c0_11 = arith.constant 0 : index
    %c0_12 = arith.constant 0 : index
    %27 = vector.load %arg3[%c0_10, %c0_11, %c0_12] : memref<1x2x128xf32, #tpu.memory_space<vmem>>, vector<1x1x128xf32>
    %28 = vector.shape_cast %27 : vector<1x1x128xf32> to vector<1x128xf32>
    %29 = vector.shape_cast %26 : vector<1x128xf32> to vector<1x1x128xf32>
    tpu.vector_store %arg3[%c0_10, %c0_11, %c0_12], %29 {strides = array<i32>} : memref<1x2x128xf32, #tpu.memory_space<vmem>>, vector<1x1x128xf32>,
    %cst_13 = arith.constant dense<0.000000e+00> : vector<128xf32>
    %30 = vector.multi_reduction <add>, %24, %cst_13 [0] : vector<8x128xf32> to vector<128xf32>
    %31 = vector.shape_cast %30 : vector<128xf32> to vector<1x128xf32>
    %c0_14 = arith.constant 0 : index
    %c1 = arith.constant 1 : index
    %c0_15 = arith.constant 0 : index
    %32 = vector.load %arg3[%c0_14, %c1, %c0_15] : memref<1x2x128xf32, #tpu.memory_space<vmem>>, vector<1x1x128xf32>
    %33 = vector.shape_cast %32 : vector<1x1x128xf32> to vector<1x128xf32>
    %34 = vector.shape_cast %31 : vector<1x128xf32> to vector<1x1x128xf32>
    tpu.vector_store %arg3[%c0_14, %c1, %c0_15], %34 {strides = array<i32>} : memref<1x2x128xf32, #tpu.memory_space<vmem>>, vector<1x1x128xf32>,
    return
  }
  func.func @transform_0(%arg0: i32) -> (i32, i32) {
    %c0_i32 = arith.constant 0 : i32
    %c0_i32_0 = arith.constant 0 : i32
    return %arg0, %c0_i32 : i32, i32
  }
  func.func @transform_1(%arg0: i32) -> (i32, i32) {
    %c0_i32 = arith.constant 0 : i32
    %c0_i32_0 = arith.constant 0 : i32
    return %arg0, %c0_i32 : i32, i32
  }
  func.func @transform_2(%arg0: i32) -> (i32, i32, i32) {
    %c0_i32 = arith.constant 0 : i32
    %c0_i32_0 = arith.constant 0 : i32
    %c0_i32_1 = arith.constant 0 : i32
    return %arg0, %c0_i32, %c0_i32_0 : i32, i32, i32
  }
}

</mosaic_0001>

<bundles_post_ra>
// kernel: tpu_custom_call.1
= control target key start
LH: loop header
LB: loop body
LE: loop exit
PB: predicated region body
PF: predicated region fallthrough
CT: control target
= control target key end

     0   :  { %7 = vsyncpa [#allocation3], 0  ;;  %s743_s0 = inlined_call_operand.hbm [shape: f32[16,128], index: 0, kind: input, shape index: {}]   ;;  %s744_s1 = inlined_call_operand.hbm [shape: f32[16,128], index: 1, kind: input, shape index: {}]   ;;  %s745_s2 = inlined_call_operand.hbm [shape: f32[2,2,128], index: 2, kind: output, shape index: {}]  }
   0x1   :  { %9 = vsyncpa [#allocation3 + $0x1], 0 }
   0x2   :  { %10 = vsyncpa [#allocation6], 0 }
   0x3   :  { %12 = vsyncpa [#allocation6 + $0x1], 0 }
   0x4   :  { %13 = vsyncpa [#allocation4], 0 }
   0x5   :  { %15 = vsyncpa [#allocation4 + $0x1], 0  ;;  %s582_s9 = smov 0   ;;  %s584_s10 = smov 0  }
   0x6   :  { %s586_s11 = smov 0   ;;  %s588_s12 = smov 0  }
   0x7 LB: > { %s603_s13 = sadd.s32 4294967295, %s565_s12   ;;  %s363_s14 = sadd.s32 4294967294, %s565_s12   ;;  %s565_s12 = sphi %s588_s12, %s756_s12   ;;  %s561_s11 = sphi %s586_s11, %s755_s11   ;;  %s557_s10 = sphi %s584_s10, %s754_s10   ;;  %s553_s9 = sphi %s582_s9, %s753_s9  }
   0x8   : > { %s607_s15 = sadd.s32 1, %s565_s12   ;;  %s28_s16 = sadd.s32 1, %s561_s11 }
   0x9   : > { %s25_s17 = ssub.s32 %s565_s12, %s607_s15  ;;  %p35_p0 = scmp.ne.s32.totalorder %s561_s11, %s557_s10 }
   0xa   : > { %p26_p1 = scmp.eq.s32.totalorder %s25_s17, 0  ;;  %p36_p2 = scmp.eq.s32.totalorder %s565_s12, 0 }
   0xb   : > { %p41_p3 = scmp.ne.s32.totalorder %s557_s10, %s553_s9  ;;  %p42_p4 = scmp.eq.s32.totalorder %s603_s13, 0 }
   0xc   : > { %s619_s18 = scalar_select %p26_p1, %s561_s11, %s28_s16  }
   0xd   : > { %p621_p5 = por %p36_p2, %p35_p0  ;;  %p625_p6 = por %p42_p4, %p41_p3 }
   0xe   : > { %p91_p7 = scmp.eq.s32.totalorder %s603_s13, 1  ;;  %p97_p8 = scmp.eq.s32.totalorder %s363_s14, 1 }
   0xf   : > { %p395_p10 = scmp.lt.s32.totalorder %s565_s12, 2  ;;  %s641_s23 = sand.u32 1, %s561_s11  }
  0x10   : > { %p632_p11 = por %p91_p7, %p35_p0  ;;  %p636_p12 = por %p97_p8, %p41_p3 }
  0x11   : > { %s367_s24 = sshll.u32 %s565_s12, 3  ;;  %s366_s25 = sshll.u32 %s641_s23, 3 }
  0x12   : > { %s125_s28 = scalar_lea.hbm %s743_s0, %s367_s24  ;;  %s121_s30 = scalar_lea.vmem [#allocation2], %s366_s25 }
  0x13   : > { %s127_s29 = sshll.u32 %s125_s28, 4  ;;  %s129_s3 = sshll.u32 %s121_s30, 4  ;;  %s128_s29 = int_to_ptr.hbm [resolvable:$true] %s127_s29  ;;  %s130_s3 = int_to_ptr.vmem [resolvable:$true] %s129_s3 }
  0x14   : > { %p650_p13 = pnand %p395_p10, %p621_p5  ;;  %p370_p0 = scmp.ge.s32.totalorder %s565_s12, 1 }
  0x15   : > { %p153_p1 = scmp.lt.s32.totalorder %s565_s12, 3  ;;  %s118_s5 = scalar_lea.sflag [#allocation3], %s641_s23 }
  0x16   : > { %s435_s6 = sshra.s32 %s128_s29, 4  ;;  %p439_p3 = pneg %p650_p13  ;;  %s436_s6 = int_to_ptr.hbm [resolvable:$true] %s435_s6 }
  0x17   : > { %s437_s7 = scalar_lea.hbm %s436_s6, 8  ;;  %s442_s16 = scalar_lea.hbm %s743_s0, 16 }
  0x18   : > { %p438_p2 = scmp.ne.s32.totalorder %s436_s6, %s437_s7  ;;  %p443_p5 = scmp.lt.s32.totalorder %s436_s6, %s743_s0 }
  0x19   : > { %p444_p8 = scmp.lt.s32.totalorder %s442_s16, %s437_s7 }
  0x1a   : > { %p440_p4 = pnand %p439_p3, %p438_p2 }
  0x1b   : > { %p445_p10 = por %p444_p8, %p443_p5 }
  0x1c   : > { %p441_p7 = pneg %p440_p4 }
  0x1e   : > { %p446_p9 = pnand %p445_p10, %p441_p7 }
  0x20   : > { %449 = shalt.err (!%p446_p9)
}
  0x21   : > { %387 = dma.hbm_to_vmem [thread:$0]  (!%p650_p13), %s128_s29, 128, %s130_s3, %s118_s5  }
  0x22   : > { %p674_p2 = pnand %p370_p0, %p153_p1  ;;  %s144_s30 = scalar_lea.hbm %s744_s1, %s367_s24 }
  0x23   : > { %s146_s6 = sshll.u32 %s144_s30, 4  ;;  %s140_s7 = scalar_lea.vmem [#allocation5], %s366_s25  ;;  %s147_s6 = int_to_ptr.hbm [resolvable:$true] %s146_s6 }
  0x24   : > { %s148_s8 = sshll.u32 %s140_s7, 4  ;;  %s137_s14 = scalar_lea.sflag [#allocation6], %s641_s23  ;;  %s149_s8 = int_to_ptr.vmem [resolvable:$true] %s148_s8 }
  0x25   : > { %s465_s16 = sshra.s32 %s147_s6, 4  ;;  %s472_s5 = scalar_lea.hbm %s744_s1, 16  ;;  %s466_s16 = int_to_ptr.hbm [resolvable:$true] %s465_s16 }
  0x26   : > { %s467_s17 = scalar_lea.hbm %s466_s16, 8  ;;  %p473_p4 = scmp.lt.s32.totalorder %s466_s16, %s744_s1 }
  0x27   : > { %p468_p9 = scmp.ne.s32.totalorder %s466_s16, %s467_s17  ;;  %p474_p7 = scmp.lt.s32.totalorder %s472_s5, %s467_s17 }
  0x29   : > { %p470_p0 = pnand %p468_p9, %p439_p3  ;;  %p475_p5 = por %p474_p7, %p473_p4 }
  0x2b   : > { %p471_p1 = pneg %p470_p0 }
  0x2d   : > { %p476_p8 = pnand %p475_p5, %p471_p1 }
  0x2f   : > { %479 = shalt.err (!%p476_p8)
}
  0x30   : > { %390 = dma.hbm_to_vmem [thread:$0]  (!%p650_p13), %s147_s6, 128, %s149_s8, %s137_s14  }
  0x31   : > { %157 = sbr.rel (%p674_p2) target bundleno = 115 (0x73), region = 28  ;;  %s696_s23 = sand.u32 (!%p674_p2), 1, %s557_s10  }
  0x32   : > { %s371_s25 = sshll.u32 (!%p674_p2), %s696_s23, 3  ;;  %s160_s27 = scalar_lea.sflag (!%p674_p2), [#allocation3], %s696_s23 }
  0x33   : > { %s163_s28 = scalar_lea.vmem (!%p674_p2), [#allocation2], %s371_s25 }
  0x36   : > { %540 = dma.done.wait (%p625_p6), %s160_s27, 128  }
  0x37   : > { %542 = vsyncadd (%p625_p6), %s160_s27, 4294967168  ;;  %s170_s4 = scalar_lea.sflag [#allocation6], %s696_s23  ;;  %s173_s30 = scalar_lea.vmem [#allocation5], %s371_s25 }
  0x38   : > { %544 = dma.done.wait (%p625_p6), %s170_s4, 128  }
  0x39   : > { %546 = vsyncadd (%p625_p6), %s170_s4, 4294967168  ;;  %v200_v0 = vld [vmem:[%s163_s28] sm:$0xff]  ;;  %v201_v3 = vld [vmem:[%s173_s30] sm:$0xff]  ;;  %s373_s20 = sshll.u32 %s696_s23, 1  ;;  %s375_s26 = sshll.u32 %s603_s13, 1 }
  0x3a   : > { %v202_v1 = vmul.f32 0.5, %v200_v0  ;;  %v209_v6 = vsub.f32 1.0, %v201_v3  ;;  %s265_s8 = scalar_lea.hbm %s745_s2, %s375_s26  ;;  %s199_s14 = scalar_lea.vmem [#allocation7], %s373_s20 }
  0x3b   : > { %s267_s16 = sshll.u32 %s199_s14, 4  ;;  %s269_s17 = sshll.u32 %s265_s8, 4  ;;  %s268_s16 = int_to_ptr.vmem [resolvable:$true] %s267_s16  ;;  %s270_s17 = int_to_ptr.hbm [resolvable:$true] %s269_s17 }
  0x3c   : > { %429 = vtanh.f32 %v202_v1  ;;  %s255_s13 = scalar_lea.sflag [#allocation4], %s696_s23  ;;  %s509_s29 = sshra.s32 %s270_s17, 4  ;;  %s510_s29 = int_to_ptr.hbm [resolvable:$true] %s509_s29 }
  0x3d   : > { %s511_s3 = scalar_lea.hbm %s510_s29, 2  ;;  %s515_s24 = scalar_lea.hbm %s745_s2, 4 }
  0x3e   : > { %p512_p6 = scmp.ne.s32.totalorder %s510_s29, %s511_s3  ;;  %p516_p10 = scmp.lt.s32.totalorder %s510_s29, %s745_s2 }
  0x3f   : > { %p517_p2 = scmp.lt.s32.totalorder %s515_s24, %s511_s3 }
  0x40   : > { %p513_p13 = pnand %p512_p6, %p632_p11 }
  0x41   : > { %p518_p9 = por %p517_p2, %p516_p10 }
  0x42   : > { %v430_v2 = vpop.eup %429  ;;  %p514_p3 = pneg %p513_p13 }
  0x43   : > { %v204_v4 = vadd.f32 1.0, %v430_v2 }
  0x44   : > { %p519_p0 = pnand %p518_p9, %p514_p3 }
  0x45   : > { %v205_v5 = vmul.f32 0.5, %v204_v4 }
  0x47   : > { %v206_v7 = vmul.f32 %v205_v5, %v201_v3  ;;  %v208_v8 = vsub.f32 1.0, %v205_v5 }
  0x49   : > { %v207_v9 = vsub.f32 1.0, %v206_v7  ;;  %v210_v10 = vmul.f32 %v209_v6, %v208_v8 }
  0x4b   : > { %431 = vrsqrt.f32 %v207_v9  ;;  %v211_v11 = vsub.f32 1.0, %v210_v10  ;;  %vm220_vm0 = vcmp.eq.f32.partialorder %v207_v9, inf  ;;  %v223_v22 = vand.u32 2147483648, %v207_v9 }
  0x4c   : > { %v212_v24 = vmul.f32 %v207_v9, %v207_v9  ;;  %vm222_vm1 = vcmp.eq.f32.partialorder %v207_v9, 0.0 }
  0x4d   : > { %433 = vrsqrt.f32 %v211_v11  ;;  %vm234_vm2 = vcmp.eq.f32.partialorder %v211_v11, inf  ;;  %v237_v28 = vand.u32 2147483648, %v211_v11  ;;  %v226_v30 = vmul.f32 %v211_v11, %v211_v11 }
  0x4e   : > { %vm236_vm3 = vcmp.eq.f32.partialorder %v211_v11, 0.0 }
  0x51   : > { %v432_v12 = vpop.eup %431 }
  0x52   : > { %v214_v13 = vmul.f32 %v432_v12, %v207_v9 }
  0x53   : > { %v434_v14 = vpop.eup %433 }
  0x54   : > { %v215_v15 = vmul.f32 %v432_v12, %v214_v13  ;;  %v228_v16 = vmul.f32 %v434_v14, %v211_v11 }
  0x56   : > { %v216_v17 = vmul.f32 0.5, %v215_v15  ;;  %v229_v18 = vmul.f32 %v434_v14, %v228_v16 }
  0x58   : > { %v217_v19 = vsub.f32 1.5, %v216_v17  ;;  %v230_v20 = vmul.f32 0.5, %v229_v18 }
  0x5a   : > { %v218_v21 = vmul.f32 %v432_v12, %v217_v19  ;;  %v231_v23 = vsub.f32 1.5, %v230_v20 }
  0x5c   : > { %v219_v25 = vmul.f32 %v218_v21, %v207_v9  ;;  %v232_v26 = vmul.f32 %v434_v14, %v231_v23 }
  0x5e   : > { %v221_v27 = vsel %vm220_vm0, %v207_v9, %v219_v25  ;;  %v233_v31 = vmul.f32 %v232_v26, %v211_v11 }
  0x5f   : > { %v224_v29 = vsel %vm222_vm1, %v223_v22, %v221_v27 }
  0x60   : > { %v225_v32 = vmul.f32 %v224_v29, %v212_v24  ;;  %v235_v33 = vsel %vm234_vm2, %v211_v11, %v233_v31 }
  0x61   : > { %v238_v35 = vsel %vm236_vm3, %v237_v28, %v235_v33 }
  0x62   : > { %v240_v34 = vrot.slane %v225_v32, 4  ;;  %v239_v36 = vmul.f32 %v238_v35, %v226_v30 }
  0x64   : > { %v241_v37 = vadd.f32 %v240_v34, %v225_v32  ;;  %v247_v38 = vrot.slane %v239_v36, 4 }
  0x66   : > { %v242_v39 = vrot.slane %v241_v37, 2  ;;  %v248_v40 = vadd.f32 %v247_v38, %v239_v36 }
  0x68   : > { %v243_v41 = vadd.f32 %v242_v39, %v241_v37  ;;  %v249_v42 = vrot.slane %v248_v40, 2 }
  0x6a   : > { %v244_v43 = vrot.slane %v243_v41, 1  ;;  %v250_v44 = vadd.f32 %v249_v42, %v248_v40 }
  0x6c   : > { %v245_v45 = vadd.f32 %v244_v43, %v243_v41  ;;  %v251_v46 = vrot.slane %v250_v44, 1 }
  0x6e   : > { %246 = vst [vmem:[%s199_s14] sm:$0x1] %v245_v45  ;;  %v252_v47 = vadd.f32 %v251_v46, %v250_v44 }
  0x70   : > { %253 = vst [vmem:[%s199_s14 + $0x1] sm:$0x1] %v252_v47 }
  0x71   : > { %522 = shalt.err (!%p519_p0)
}
  0x72   : > { %382 = dma.vmem_to_hbm [thread:$0]  (%p632_p11), %s268_s16, 32, %s270_s17, %s255_s13  }
  0x73 PF: > { %s281_s23 = sand.u32 1, %s553_s9   ;;  %p752_p1 = scmp.ge.s32.totalorder %s565_s12, 2 }
  0x74   : > { %s282_s28 = scalar_lea.sflag [#allocation4], %s281_s23 }
  0x75   : > { %p392_p4 = pnand %p752_p1, %p636_p12 }
  0x77   : > { %p393_p7 = pneg %p392_p4 }
  0x79   : > { %548 = dma.done.wait (%p393_p7), %s282_s28, 32  }
  0x7a   : > { %550 = vsyncadd (%p393_p7), %s282_s28, 4294967264  ;;  %p18_p5 = scmp.ge.s32.totalorder %s607_s15, 4   ;;  %s753_s9 = smov %s557_s10 }
  0x7b   : > { %s754_s10 = smov %s561_s11  ;;  %s755_s11 = smov %s619_s18 }
  0x7c   : > { %s756_s12 = smov %s607_s15  ;;  %20 = sbr.rel (!%p18_p5) target bundleno = 7 (0x7), region = 86 }
  0x81   :  { %288 = vsyncpa [#allocation3], 1 }
  0x82   :  { %290 = vsyncpa [#allocation3 + $0x1], 1 }
  0x83   :  { %291 = vsyncpa [#allocation6], 1 }
  0x84   :  { %293 = vsyncpa [#allocation6 + $0x1], 1 }
  0x85   :  { %294 = vsyncpa [#allocation4], 1 }
  0x86   :  { %296 = vsyncpa [#allocation4 + $0x1], 1 }

</bundles_post_ra>
